<compile_context>
chip_gen: v7x
topology: tpu7x:2x2x1
jax: 0.10.0
libtpu: 0.0.40
codegen_flags: <defaults>
</compile_context>

<pallas_src>
import functools

import jax
import jax.numpy as jnp
from jax import lax
from jax.experimental import pallas as pl
from jax.experimental.pallas import tpu as pltpu
import numpy as np


def _elu(v):
    # ELU(alpha=1).  exp(min(v,0)) - 1 keeps exp on the EUP and avoids overflow.
    return jnp.where(v > 0, v, jnp.exp(jnp.minimum(v, 0.0)) - 1.0)


def _sigmoid_kernel(v):
    # sigmoid(v) = 0.5*(tanh(v/2)+1): transcendental on EUP, no VALU divide.
    return 0.5 * (jnp.tanh(0.5 * v) + 1.0)


def _round_up(n, m):
    return ((n + m - 1) // m) * m


def basic_block_kernel(x_ref, w1_ref, b1_ref, w2_ref, b2_ref, o_ref,
                       carry_ex_ref, carry_h1_ref, *, width):
    # x_ref : [1, C, S]  f32, S = TH * W (row block, spatial flattened row-major)
    # w1_ref: [C,  4C]   matmul dtype (tap-major packed columns, t = ky*2 + kx)
    # b1_ref: [C,  1]    f32
    # w2_ref: [2C, 4C]   matmul dtype
    # b2_ref: [2C, 1]    f32
    # o_ref : [1, C, S]  f32
    # carry_*_ref: [C, CARRY] scratch (CARRY = round_up(W,128) <= S); lanes
    #              [0, W) hold the previous row block's last image row (the
    #              causal halo).  Carry is stored in the matmul compute dtype,
    #              i.e. bf16-rounded on the bf16 path (same precision as the
    #              in-block taps).
    _, C, S = x_ref.shape
    W = width
    cdt = w1_ref.dtype                      # matmul compute dtype (bf16 or f32)
    CARRY = carry_ex_ref.shape[1]           # lane-aligned halo chunk, >= W

    # Reset the causal carries at the top of each image.
    @pl.when(pl.program_id(1) == 0)
    def _():
        carry_ex_ref[...] = jnp.zeros_like(carry_ex_ref)
        carry_h1_ref[...] = jnp.zeros_like(carry_h1_ref)

    # Narrow (1, S)/(1, CARRY) masks; jnp.where broadcasts them over sublanes.
    lane = lax.broadcasted_iota(jnp.int32, (1, S), 1)
    if (W & (W - 1)) == 0:
        col0 = (lane & (W - 1)) == 0        # j == 0 (power-of-two fast path)
    else:
        col0 = (lane % W) == 0              # j == 0 (W is a compile-time const)
    lane_c = lax.broadcasted_iota(jnp.int32, (1, CARRY), 1)
    first_row_c = lane_c < W                # block's first image row (within chunk)

    def packed_taps(a, carry_ref):
        # a: [C, S]. Returns [4C, S] with sublane groups
        #   [0:C)->a[i-1,j-1], [C:2C)->a[i-1,j], [2C:3C)->a[i,j-1], [3C:4C)->a[i,j]
        # matching the tap-major packed weight columns (t = ky*2 + kx).
        rolled = pltpu.roll(a, shift=W, axis=1)          # a[i-1, j] (wraps at top)
        # Halo splice and carry update restricted to the first CARRY lanes only.
        head = jnp.where(first_row_c, carry_ref[...], rolled[:, :CARRY])
        carry_ref[...] = rolled[:, :CARRY]               # new halo for next block
        if S > CARRY:
            dn = jnp.concatenate([head, rolled[:, CARRY:]], axis=1)
        else:
            dn = head
        sr = jnp.where(col0, 0.0, pltpu.roll(a, shift=1, axis=1))
        dn_sr = jnp.where(col0, 0.0, pltpu.roll(dn, shift=1, axis=1))
        return jnp.concatenate([dn_sr, dn, sr, a], axis=0)   # [4C, S]

    def causal_conv(a, carry_ref, w_ref, b_ref):
        # Single K = 4C matmul on the MXU, f32 accumulation, bias added once.
        taps = packed_taps(a, carry_ref)
        out = jnp.dot(w_ref[...], taps, preferred_element_type=jnp.float32)
        return out + b_ref[...]                               # [Cout, S] f32

    ex = _elu(x_ref[0, :, :]).astype(cdt)                     # [C, S]
    h1 = causal_conv(ex, carry_ex_ref, w1_ref, b1_ref)        # [C, S]  f32
    h1 = _elu(h1).astype(cdt)
    h2 = causal_conv(h1, carry_h1_ref, w2_ref, b2_ref)        # [2C, S] f32

    # GatedActivation (PixelCNN++ style): split channels, x1 * sigmoid(x2).
    x1 = h2[:C, :]
    x2 = h2[C:, :]
    # Re-read x from the resident input buffer only here (no long-lived temp).
    x_res = x_ref[0, :, :]
    o_ref[0, :, :] = (x_res + x1 * _sigmoid_kernel(x2)).astype(o_ref.dtype)


def _pick_block_rows(H, W, C, act_budget_bytes=3 << 20):
    """Largest TH with H % TH == 0, TH*W a multiple of 128 (lane-dense blocks)
    and the f32 activation block C*TH*W*4 <= act_budget_bytes.  Live VMEM is
    roughly 12-16x the raw activation block (double-buffered I/O, tap pack,
    conv2 output, carries), so ~3 MiB keeps the total comfortably inside v7x's
    64 MiB while large enough to amortize the ~0.35us per-step overhead and
    feed the HBM roofline."""
    candidates = [
        th for th in range(1, H + 1)
        if H % th == 0 and (th * W) % 128 == 0 and C * th * W * 4 <= act_budget_bytes
    ]
    if not candidates:
        return H  # fall back: one block per image (block dims == full dims)
    return max(candidates)


def basic_block_pallas(x_ncs, w1_mat, b1_col, w2_mat, b2_col, *, height, width,
                       block_rows=None, act_budget_bytes=3 << 20,
                       vmem_limit_bytes=None):
    """x_ncs: [B, C, H*W] f32 (channels-first, spatial flattened row-major).
    w*_mat: tap-packed conv weights [Cout, 4*Cin] (see pack_conv_weight), in the
    matmul dtype -- bf16 recommended on ALL generations (v5e/v6e/v7x MXUs are
    bf16-native; accumulation is f32).  b*_col: [Cout, 1] f32."""
    B, C, S_total = x_ncs.shape
    assert S_total == height * width
    C2 = w2_mat.shape[0]
    assert w1_mat.shape == (C, 4 * C) and w2_mat.shape == (C2, 4 * C)
    assert b1_col.shape == (C, 1) and b2_col.shape == (C2, 1)
    compute_dtype = w1_mat.dtype

    TH = (_pick_block_rows(height, width, C, act_budget_bytes)
          if block_rows is None else block_rows)
    assert height % TH == 0
    S = TH * width
    # Lane-dense blocks (no masked vst.msk) unless a single block spans the image.
    assert S % 128 == 0 or TH == height, (
        "block_rows*width must be a multiple of 128 (or block_rows == height)")

    carry_s = min(_round_up(width, 128), S)
    # Grid: batch axis "parallel" (megacore sharding, per-core private scratch),
    # row-block axis "arbitrary" (sequential per image -- required for the
    # causal halo carry; do NOT reorder or mark it parallel).
    grid = (B, height // TH)

    if vmem_limit_bytes is None:
        itemsize = jnp.dtype(compute_dtype).itemsize
        block_f32 = C * S * 4
        taps_bytes = 4 * C * S * itemsize
        h2_bytes = C2 * S * 4
        weight_bytes = (C * 4 * C + C2 * 4 * C) * itemsize + (C + C2) * 4
        est = (4 * block_f32 + 2 * taps_bytes + 2 * h2_bytes
               + 2 * weight_bytes + (4 << 20))
        # >= 32 MiB (default scoped limit on v6e/v7x); capped at 48 MiB so
        # double-buffering survives v7x's 64 MiB physical VMEM.  v5e/v6e have
        # 128 MiB physical so raising above their defaults is safe.
        vmem_limit_bytes = int(min(max(est, 32 << 20), 48 << 20))

    kernel = functools.partial(basic_block_kernel, width=width)
    return pl.pallas_call(
        kernel,
        out_shape=jax.ShapeDtypeStruct((B, C, S_total), x_ncs.dtype),
        grid_spec=pltpu.PrefetchScalarGridSpec(
            num_scalar_prefetch=0,
            grid=grid,
            in_specs=[
                pl.BlockSpec((1, C, S), lambda b, h: (b, 0, h)),
                pl.BlockSpec((C, 4 * C), lambda b, h: (0, 0)),
                pl.BlockSpec((C, 1), lambda b, h: (0, 0)),
                pl.BlockSpec((C2, 4 * C), lambda b, h: (0, 0)),
                pl.BlockSpec((C2, 1), lambda b, h: (0, 0)),
            ],
            out_specs=pl.BlockSpec((1, C, S), lambda b, h: (b, 0, h)),
            scratch_shapes=[
                pltpu.VMEM((C, carry_s), compute_dtype),  # elu(x)     halo carry
                pltpu.VMEM((C, carry_s), compute_dtype),  # elu(conv1) halo carry
            ],
        ),
        compiler_params=pltpu.CompilerParams(
            dimension_semantics=("parallel", "arbitrary"),
            vmem_limit_bytes=vmem_limit_bytes,
        ),
    )(x_ncs, w1_mat, b1_col, w2_mat, b2_col)


# ----------------------------- parameter glue --------------------------------

def weight_norm(v, g):
    # v: [Cout, Cin, kH, kW], g: [Cout]  ->  w = g * v / ||v|| (norm per out channel)
    norm = jnp.sqrt(jnp.sum(v * v, axis=(1, 2, 3), keepdims=True))
    return g[:, None, None, None] * v / norm


def pack_conv_weight(w_oihw, dtype):
    # [Cout, Cin, 2, 2] -> [Cout, ky, kx, Cin] -> [Cout, 4*Cin]
    # column index = (ky*2 + kx)*Cin + ci, matching the kernel's sublane packing.
    co, ci, kh, kw = w_oihw.shape
    return jnp.transpose(w_oihw, (0, 2, 3, 1)).reshape(co, kh * kw * ci).astype(dtype)


def reference_forward(x_nchw, w1_oihw, b1, w2_oihw, b2, hidden):
    # Pure-JAX f32 reference of the PyTorch module (NCHW in/out).
    xn = jnp.transpose(x_nchw, (0, 2, 3, 1))
    h = _elu(xn)
    w1_hwio = jnp.transpose(w1_oihw, (2, 3, 1, 0))
    out = lax.conv_general_dilated(
        h, w1_hwio, (1, 1), ((1, 0), (1, 0)),
        dimension_numbers=("NHWC", "HWIO", "NHWC"),
        precision=lax.Precision.HIGHEST) + b1
    out = _elu(out)
    w2_hwio = jnp.transpose(w2_oihw, (2, 3, 1, 0))
    out = lax.conv_general_dilated(
        out, w2_hwio, (1, 1), ((1, 0), (1, 0)),
        dimension_numbers=("NHWC", "HWIO", "NHWC"),
        precision=lax.Precision.HIGHEST) + b2
    x1, x2 = out[..., :hidden], out[..., hidden:]
    o = xn + x1 * (1.0 / (1.0 + jnp.exp(-x2)))
    return jnp.transpose(o, (0, 3, 1, 2))


if __name__ == "__main__":
    B, hidden, H, W = 2, 32, 16, 16

    key = jax.random.PRNGKey(0)
    k_x, k_v1, k_g1, k_b1, k_v2, k_g2, k_b2 = jax.random.split(key, 7)

    # Input in PyTorch NCHW convention.
    x_nchw = jax.random.normal(k_x, (B, hidden, H, W), jnp.float32)

    # conv1: WN(Conv2d(hidden, hidden, 2, padding=1))
    v1 = jax.random.normal(k_v1, (hidden, hidden, 2, 2), jnp.float32) * 0.1
    g1 = 0.5 + jax.random.uniform(k_g1, (hidden,), jnp.float32)
    b1 = jax.random.normal(k_b1, (hidden,), jnp.float32) * 0.1
    w1 = weight_norm(v1, g1)

    # conv2: WN(Conv2d(hidden, 2*hidden, 2, padding=1))
    v2 = jax.random.normal(k_v2, (2 * hidden, hidden, 2, 2), jnp.float32) * 0.1
    g2 = 0.5 + jax.random.uniform(k_g2, (2 * hidden,), jnp.float32)
    b2 = jax.random.normal(k_b2, (2 * hidden,), jnp.float32) * 0.1
    w2 = weight_norm(v2, g2)

    # Kernel-side layout: channels-first with spatial flattened (free reshape).
    x_ncs = x_nchw.reshape(B, hidden, H * W)
    b1_col = b1.reshape(hidden, 1)
    b2_col = b2.reshape(2 * hidden, 1)

    ref = jax.block_until_ready(reference_forward(x_nchw, w1, b1, w2, b2, hidden))

    # 1) f32-matmul path, whole-image block (default heuristic picks TH=H here):
    #    structural check of tap packing, shifts, gating, residual.
    out_f32 = basic_block_pallas(
        x_ncs, pack_conv_weight(w1, jnp.float32), b1_col,
        pack_conv_weight(w2, jnp.float32), b2_col, height=H, width=W)
    out_f32 = jax.block_until_ready(out_f32.reshape(B, hidden, H, W))
    np.testing.assert_allclose(np.asarray(out_f32), np.asarray(ref),
                               rtol=1e-3, atol=1e-3)

    # 2) f32-matmul path with a forced 2-block split (block_rows=8): exercises
    #    the causal-halo carry across row blocks.
    out_blk = basic_block_pallas(
        x_ncs, pack_conv_weight(w1, jnp.float32), b1_col,
        pack_conv_weight(w2, jnp.float32), b2_col, height=H, width=W,
        block_rows=8)
    out_blk = jax.block_until_ready(out_blk.reshape(B, hidden, H, W))
    np.testing.assert_allclose(np.asarray(out_blk), np.asarray(ref),
                               rtol=1e-3, atol=1e-3)

    # 3) bf16-matmul path (recommended on v5e/v6e/v7x): bf16 MXU operands with
    #    f32 accumulation; elementwise math stays f32.  Looser tolerance covers
    #    bf16 rounding only.
    out_bf16 = basic_block_pallas(
        x_ncs, pack_conv_weight(w1, jnp.bfloat16), b1_col,
        pack_conv_weight(w2, jnp.bfloat16), b2_col, height=H, width=W)
    out_bf16 = jax.block_until_ready(out_bf16.reshape(B, hidden, H, W))
    np.testing.assert_allclose(np.asarray(out_bf16), np.asarray(ref),
                               rtol=5e-2, atol=5e-2)

    print("KERNEL_OK")
</pallas_src>

<mosaic_0001>
module attributes {stable_mosaic.version = 11 : i64} {
  func.func @basic_block_kernel(%arg0: i32, %arg1: i32, %arg2: memref<1x32x256xf32, #tpu.memory_space<vmem>>, %arg3: memref<32x128xf32, #tpu.memory_space<vmem>>, %arg4: memref<32x1xf32, #tpu.memory_space<vmem>>, %arg5: memref<64x128xf32, #tpu.memory_space<vmem>>, %arg6: memref<64x1xf32, #tpu.memory_space<vmem>>, %arg7: memref<1x32x256xf32, #tpu.memory_space<vmem>>, %arg8: memref<32x128xf32, #tpu.memory_space<vmem>>, %arg9: memref<32x128xf32, #tpu.memory_space<vmem>>) attributes {dimension_semantics = [#tpu.dimension_semantics<parallel>, #tpu.dimension_semantics<arbitrary>], iteration_bounds = array<i64: 2, 1>, scalar_prefetch = 0 : i64, scratch_operands = 2 : i64, tpu.core_type = #tpu.core_type<tc>, window_params = [{transform_indices = @transform_0, window_bounds = array<i64: 1, 32, 256>}, {pipeline_mode = #tpu.pipeline_mode<synchronous>, transform_indices = @transform_1, window_bounds = array<i64: 32, 128>}, {pipeline_mode = #tpu.pipeline_mode<synchronous>, transform_indices = @transform_2, window_bounds = array<i64: 32, 1>}, {pipeline_mode = #tpu.pipeline_mode<synchronous>, transform_indices = @transform_3, window_bounds = array<i64: 64, 128>}, {pipeline_mode = #tpu.pipeline_mode<synchronous>, transform_indices = @transform_4, window_bounds = array<i64: 64, 1>}, {transform_indices = @transform_5, window_bounds = array<i64: 1, 32, 256>}]} {
    %c0_i32 = arith.constant 0 : i32
    %0 = arith.cmpi eq, %arg1, %c0_i32 : i32
    %1 = arith.extui %0 : i1 to i32
    %c0_i32_0 = arith.constant 0 : i32
    %2 = arith.cmpi ne, %1, %c0_i32_0 : i32
    scf.if %2 {
      %cst_45 = arith.constant 0.000000e+00 : f32
      %97 = vector.broadcast %cst_45 : f32 to vector<32x128xf32>
      %c0_46 = arith.constant 0 : index
      %c0_47 = arith.constant 0 : index
      %98 = vector.load %arg8[%c0_46, %c0_47] : memref<32x128xf32, #tpu.memory_space<vmem>>, vector<32x128xf32>
      tpu.vector_store %arg8[%c0_46, %c0_47], %97 {strides = array<i32>} : memref<32x128xf32, #tpu.memory_space<vmem>>, vector<32x128xf32>,
      %cst_48 = arith.constant 0.000000e+00 : f32
      %99 = vector.broadcast %cst_48 : f32 to vector<32x128xf32>
      %c0_49 = arith.constant 0 : index
      %c0_50 = arith.constant 0 : index
      %100 = vector.load %arg9[%c0_49, %c0_50] : memref<32x128xf32, #tpu.memory_space<vmem>>, vector<32x128xf32>
      tpu.vector_store %arg9[%c0_49, %c0_50], %99 {strides = array<i32>} : memref<32x128xf32, #tpu.memory_space<vmem>>, vector<32x128xf32>,
    } else {
    }
    %3 = tpu.iota {dimensions = array<i32: 1>} : vector<1x256xi32>
    %c15_i32 = arith.constant 15 : i32
    %4 = vector.broadcast %c15_i32 : i32 to vector<1x256xi32>
    %5 = arith.andi %3, %4 : vector<1x256xi32>
    %c0_i32_1 = arith.constant 0 : i32
    %6 = vector.broadcast %c0_i32_1 : i32 to vector<1x256xi32>
    %7 = arith.cmpi eq, %5, %6 : vector<1x256xi32>
    %8 = tpu.iota {dimensions = array<i32: 1>} : vector<1x128xi32>
    %c16_i32 = arith.constant 16 : i32
    %9 = vector.broadcast %c16_i32 : i32 to vector<1x128xi32>
    %10 = arith.cmpi slt, %8, %9 : vector<1x128xi32>
    %c0 = arith.constant 0 : index
    %c0_2 = arith.constant 0 : index
    %c0_3 = arith.constant 0 : index
    %11 = vector.load %arg2[%c0, %c0_2, %c0_3] : memref<1x32x256xf32, #tpu.memory_space<vmem>>, vector<1x32x256xf32>
    %12 = vector.shape_cast %11 : vector<1x32x256xf32> to vector<32x256xf32>
    %cst = arith.constant 0.000000e+00 : f32
    %13 = vector.broadcast %cst : f32 to vector<32x256xf32>
    %14 = arith.cmpf ogt, %12, %13 : vector<32x256xf32>
    %cst_4 = arith.constant 0.000000e+00 : f32
    %15 = vector.broadcast %cst_4 : f32 to vector<32x256xf32>
    %16 = arith.minimumf %12, %15 : vector<32x256xf32>
    %17 = math.exp %16 : vector<32x256xf32>
    %cst_5 = arith.constant 1.000000e+00 : f32
    %18 = vector.broadcast %cst_5 : f32 to vector<32x256xf32>
    %19 = arith.subf %17, %18 : vector<32x256xf32>
    %20 = arith.select %14, %12, %19 : vector<32x256xi1>, vector<32x256xf32>
    %c16_i32_6 = arith.constant 16 : i32
    %21 = tpu.dynamic_rotate %20 by %c16_i32_6 dim 1 : vector<32x256xf32>, i32 -> vector<32x256xf32>
    %c0_7 = arith.constant 0 : index
    %c0_8 = arith.constant 0 : index
    %22 = vector.load %arg8[%c0_7, %c0_8] : memref<32x128xf32, #tpu.memory_space<vmem>>, vector<32x128xf32>
    %23 = vector.extract_strided_slice %21 {offsets = [0, 0], sizes = [32, 128], strides = [1, 1]} : vector<32x256xf32> to vector<32x128xf32>
    %24 = vector.shape_cast %10 : vector<1x128xi1> to vector<1x128xi1>
    %25 = vector.broadcast %24 : vector<1x128xi1> to vector<32x128xi1>
    %26 = arith.select %25, %22, %23 : vector<32x128xi1>, vector<32x128xf32>
    %27 = vector.extract_strided_slice %21 {offsets = [0, 0], sizes = [32, 128], strides = [1, 1]} : vector<32x256xf32> to vector<32x128xf32>
    %c0_9 = arith.constant 0 : index
    %c0_10 = arith.constant 0 : index
    %28 = vector.load %arg8[%c0_9, %c0_10] : memref<32x128xf32, #tpu.memory_space<vmem>>, vector<32x128xf32>
    tpu.vector_store %arg8[%c0_9, %c0_10], %27 {strides = array<i32>} : memref<32x128xf32, #tpu.memory_space<vmem>>, vector<32x128xf32>,
    %29 = vector.extract_strided_slice %21 {offsets = [0, 128], sizes = [32, 128], strides = [1, 1]} : vector<32x256xf32> to vector<32x128xf32>
    %30 = tpu.concatenate %26, %29 in 1 : vector<32x128xf32>, vector<32x128xf32> -> vector<32x256xf32>
    %c1_i32 = arith.constant 1 : i32
    %31 = tpu.dynamic_rotate %20 by %c1_i32 dim 1 : vector<32x256xf32>, i32 -> vector<32x256xf32>
    %cst_11 = arith.constant 0.000000e+00 : f32
    %32 = vector.shape_cast %7 : vector<1x256xi1> to vector<1x256xi1>
    %33 = vector.broadcast %32 : vector<1x256xi1> to vector<32x256xi1>
    %34 = vector.broadcast %cst_11 : f32 to vector<32x256xf32>
    %35 = arith.select %33, %34, %31 : vector<32x256xi1>, vector<32x256xf32>
    %c1_i32_12 = arith.constant 1 : i32
    %36 = tpu.dynamic_rotate %30 by %c1_i32_12 dim 1 : vector<32x256xf32>, i32 -> vector<32x256xf32>
    %cst_13 = arith.constant 0.000000e+00 : f32
    %37 = vector.shape_cast %7 : vector<1x256xi1> to vector<1x256xi1>
    %38 = vector.broadcast %37 : vector<1x256xi1> to vector<32x256xi1>
    %39 = vector.broadcast %cst_13 : f32 to vector<32x256xf32>
    %40 = arith.select %38, %39, %36 : vector<32x256xi1>, vector<32x256xf32>
    %41 = tpu.concatenate %40, %30, %35, %20 in 0 : vector<32x256xf32>, vector<32x256xf32>, vector<32x256xf32>, vector<32x256xf32> -> vector<128x256xf32>
    %c0_14 = arith.constant 0 : index
    %c0_15 = arith.constant 0 : index
    %42 = vector.load %arg3[%c0_14, %c0_15] : memref<32x128xf32, #tpu.memory_space<vmem>>, vector<32x128xf32>
    %cst_16 = arith.constant dense<0.000000e+00> : vector<32x256xf32>
    %43 = tpu.matmul %42, %41, %cst_16 {dimension_numbers = #tpu.dot_dimension_numbers<[1], [0], [0], [1], [0, 0, 1, 1], [], []>} : vector<32x128xf32>, vector<128x256xf32>, vector<32x256xf32> -> vector<32x256xf32>
    %c0_17 = arith.constant 0 : index
    %c0_18 = arith.constant 0 : index
    %44 = vector.load %arg4[%c0_17, %c0_18] : memref<32x1xf32, #tpu.memory_space<vmem>>, vector<32x1xf32>
    %45 = vector.broadcast %44 : vector<32x1xf32> to vector<32x256xf32>
    %46 = arith.addf %43, %45 : vector<32x256xf32>
    %cst_19 = arith.constant 0.000000e+00 : f32
    %47 = vector.broadcast %cst_19 : f32 to vector<32x256xf32>
    %48 = arith.cmpf ogt, %46, %47 : vector<32x256xf32>
    %cst_20 = arith.constant 0.000000e+00 : f32
    %49 = vector.broadcast %cst_20 : f32 to vector<32x256xf32>
    %50 = arith.minimumf %46, %49 : vector<32x256xf32>
    %51 = math.exp %50 : vector<32x256xf32>
    %cst_21 = arith.constant 1.000000e+00 : f32
    %52 = vector.broadcast %cst_21 : f32 to vector<32x256xf32>
    %53 = arith.subf %51, %52 : vector<32x256xf32>
    %54 = arith.select %48, %46, %53 : vector<32x256xi1>, vector<32x256xf32>
    %c16_i32_22 = arith.constant 16 : i32
    %55 = tpu.dynamic_rotate %54 by %c16_i32_22 dim 1 : vector<32x256xf32>, i32 -> vector<32x256xf32>
    %c0_23 = arith.constant 0 : index
    %c0_24 = arith.constant 0 : index
    %56 = vector.load %arg9[%c0_23, %c0_24] : memref<32x128xf32, #tpu.memory_space<vmem>>, vector<32x128xf32>
    %57 = vector.extract_strided_slice %55 {offsets = [0, 0], sizes = [32, 128], strides = [1, 1]} : vector<32x256xf32> to vector<32x128xf32>
    %58 = vector.shape_cast %10 : vector<1x128xi1> to vector<1x128xi1>
    %59 = vector.broadcast %58 : vector<1x128xi1> to vector<32x128xi1>
    %60 = arith.select %59, %56, %57 : vector<32x128xi1>, vector<32x128xf32>
    %61 = vector.extract_strided_slice %55 {offsets = [0, 0], sizes = [32, 128], strides = [1, 1]} : vector<32x256xf32> to vector<32x128xf32>
    %c0_25 = arith.constant 0 : index
    %c0_26 = arith.constant 0 : index
    %62 = vector.load %arg9[%c0_25, %c0_26] : memref<32x128xf32, #tpu.memory_space<vmem>>, vector<32x128xf32>
    tpu.vector_store %arg9[%c0_25, %c0_26], %61 {strides = array<i32>} : memref<32x128xf32, #tpu.memory_space<vmem>>, vector<32x128xf32>,
    %63 = vector.extract_strided_slice %55 {offsets = [0, 128], sizes = [32, 128], strides = [1, 1]} : vector<32x256xf32> to vector<32x128xf32>
    %64 = tpu.concatenate %60, %63 in 1 : vector<32x128xf32>, vector<32x128xf32> -> vector<32x256xf32>
    %c1_i32_27 = arith.constant 1 : i32
    %65 = tpu.dynamic_rotate %54 by %c1_i32_27 dim 1 : vector<32x256xf32>, i32 -> vector<32x256xf32>
    %cst_28 = arith.constant 0.000000e+00 : f32
    %66 = vector.shape_cast %7 : vector<1x256xi1> to vector<1x256xi1>
    %67 = vector.broadcast %66 : vector<1x256xi1> to vector<32x256xi1>
    %68 = vector.broadcast %cst_28 : f32 to vector<32x256xf32>
    %69 = arith.select %67, %68, %65 : vector<32x256xi1>, vector<32x256xf32>
    %c1_i32_29 = arith.constant 1 : i32
    %70 = tpu.dynamic_rotate %64 by %c1_i32_29 dim 1 : vector<32x256xf32>, i32 -> vector<32x256xf32>
    %cst_30 = arith.constant 0.000000e+00 : f32
    %71 = vector.shape_cast %7 : vector<1x256xi1> to vector<1x256xi1>
    %72 = vector.broadcast %71 : vector<1x256xi1> to vector<32x256xi1>
    %73 = vector.broadcast %cst_30 : f32 to vector<32x256xf32>
    %74 = arith.select %72, %73, %70 : vector<32x256xi1>, vector<32x256xf32>
    %75 = tpu.concatenate %74, %64, %69, %54 in 0 : vector<32x256xf32>, vector<32x256xf32>, vector<32x256xf32>, vector<32x256xf32> -> vector<128x256xf32>
    %c0_31 = arith.constant 0 : index
    %c0_32 = arith.constant 0 : index
    %76 = vector.load %arg5[%c0_31, %c0_32] : memref<64x128xf32, #tpu.memory_space<vmem>>, vector<64x128xf32>
    %cst_33 = arith.constant dense<0.000000e+00> : vector<64x256xf32>
    %77 = tpu.matmul %76, %75, %cst_33 {dimension_numbers = #tpu.dot_dimension_numbers<[1], [0], [0], [1], [0, 0, 1, 1], [], []>} : vector<64x128xf32>, vector<128x256xf32>, vector<64x256xf32> -> vector<64x256xf32>
    %c0_34 = arith.constant 0 : index
    %c0_35 = arith.constant 0 : index
    %78 = vector.load %arg6[%c0_34, %c0_35] : memref<64x1xf32, #tpu.memory_space<vmem>>, vector<64x1xf32>
    %79 = vector.broadcast %78 : vector<64x1xf32> to vector<64x256xf32>
    %80 = arith.addf %77, %79 : vector<64x256xf32>
    %81 = vector.extract_strided_slice %80 {offsets = [0, 0], sizes = [32, 256], strides = [1, 1]} : vector<64x256xf32> to vector<32x256xf32>
    %82 = vector.extract_strided_slice %80 {offsets = [32, 0], sizes = [32, 256], strides = [1, 1]} : vector<64x256xf32> to vector<32x256xf32>
    %c0_36 = arith.constant 0 : index
    %c0_37 = arith.constant 0 : index
    %c0_38 = arith.constant 0 : index
    %83 = vector.load %arg2[%c0_36, %c0_37, %c0_38] : memref<1x32x256xf32, #tpu.memory_space<vmem>>, vector<1x32x256xf32>
    %84 = vector.shape_cast %83 : vector<1x32x256xf32> to vector<32x256xf32>
    %cst_39 = arith.constant 5.000000e-01 : f32
    %85 = vector.broadcast %cst_39 : f32 to vector<32x256xf32>
    %86 = arith.mulf %85, %82 : vector<32x256xf32>
    %87 = math.tanh %86 : vector<32x256xf32>
    %cst_40 = arith.constant 1.000000e+00 : f32
    %88 = vector.broadcast %cst_40 : f32 to vector<32x256xf32>
    %89 = arith.addf %87, %88 : vector<32x256xf32>
    %cst_41 = arith.constant 5.000000e-01 : f32
    %90 = vector.broadcast %cst_41 : f32 to vector<32x256xf32>
    %91 = arith.mulf %90, %89 : vector<32x256xf32>
    %92 = arith.mulf %81, %91 : vector<32x256xf32>
    %93 = arith.addf %84, %92 : vector<32x256xf32>
    %c0_42 = arith.constant 0 : index
    %c0_43 = arith.constant 0 : index
    %c0_44 = arith.constant 0 : index
    %94 = vector.load %arg7[%c0_42, %c0_43, %c0_44] : memref<1x32x256xf32, #tpu.memory_space<vmem>>, vector<1x32x256xf32>
    %95 = vector.shape_cast %94 : vector<1x32x256xf32> to vector<32x256xf32>
    %96 = vector.shape_cast %93 : vector<32x256xf32> to vector<1x32x256xf32>
    tpu.vector_store %arg7[%c0_42, %c0_43, %c0_44], %96 {strides = array<i32>} : memref<1x32x256xf32, #tpu.memory_space<vmem>>, vector<1x32x256xf32>,
    return
  }
  func.func @transform_0(%arg0: i32, %arg1: i32) -> (i32, i32, i32) {
    %c0_i32 = arith.constant 0 : i32
    %c0_i32_0 = arith.constant 0 : i32
    return %arg0, %c0_i32, %arg1 : i32, i32, i32
  }
  func.func @transform_1(%arg0: i32, %arg1: i32) -> (i32, i32) {
    %c0_i32 = arith.constant 0 : i32
    %c0_i32_0 = arith.constant 0 : i32
    %c0_i32_1 = arith.constant 0 : i32
    return %c0_i32, %c0_i32_0 : i32, i32
  }
  func.func @transform_2(%arg0: i32, %arg1: i32) -> (i32, i32) {
    %c0_i32 = arith.constant 0 : i32
    %c0_i32_0 = arith.constant 0 : i32
    %c0_i32_1 = arith.constant 0 : i32
    return %c0_i32, %c0_i32_0 : i32, i32
  }
  func.func @transform_3(%arg0: i32, %arg1: i32) -> (i32, i32) {
    %c0_i32 = arith.constant 0 : i32
    %c0_i32_0 = arith.constant 0 : i32
    %c0_i32_1 = arith.constant 0 : i32
    return %c0_i32, %c0_i32_0 : i32, i32
  }
  func.func @transform_4(%arg0: i32, %arg1: i32) -> (i32, i32) {
    %c0_i32 = arith.constant 0 : i32
    %c0_i32_0 = arith.constant 0 : i32
    %c0_i32_1 = arith.constant 0 : i32
    return %c0_i32, %c0_i32_0 : i32, i32
  }
  func.func @transform_5(%arg0: i32, %arg1: i32) -> (i32, i32, i32) {
    %c0_i32 = arith.constant 0 : i32
    %c0_i32_0 = arith.constant 0 : i32
    return %arg0, %c0_i32, %arg1 : i32, i32, i32
  }
}

</mosaic_0001>

<bundles_post_ra>
// kernel: tpu_custom_call.1
= control target key start
LH: loop header
LB: loop body
LE: loop exit
PB: predicated region body
PF: predicated region fallthrough
CT: control target
= control target key end

     0   :  { %10 = vsyncpa [#allocation5], 0  ;;  %s2322_s0 = inlined_call_operand.hbm [shape: f32[2,32,256], index: 0, kind: input, shape index: {}]   ;;  %s2323_s1 = inlined_call_operand.vmem [shape: f32[32,128], index: 1, kind: input, shape index: {}]   ;;  %s2324_s2 = inlined_call_operand.vmem [shape: f32[32,1], index: 2, kind: input, shape index: {}]   ;;  %s2325_s3 = inlined_call_operand.vmem [shape: f32[64,128], index: 3, kind: input, shape index: {}]   ;;  %s2326_s4 = inlined_call_operand.vmem [shape: f32[64,1], index: 4, kind: input, shape index: {}]   ;;  %s2327_s5 = inlined_call_operand.hbm [shape: f32[2,32,256], index: 5, kind: output, shape index: {}]  }
   0x1   :  { %12 = vsyncpa [#allocation5 + $0x1], 0 }
   0x2   :  { %13 = vsyncpa [#allocation6], 0 }
   0x3   :  { %15 = vsyncpa [#allocation6 + $0x1], 0  ;;  %s1644_s18 = smov 0   ;;  %s1646_s19 = smov 0  }
   0x4   :  { %s1648_s20 = smov 0   ;;  %s1650_s21 = smov 0  }
   0x5   :  { %s1652_s22 = smov 0   ;;  %s1654_s23 = smov 0  }
   0x6 LB: > { %s1047_s24 = sadd.s32 4294967295, %s1603_s23   ;;  %s1048_s25 = sadd.s32 4294967294, %s1603_s23   ;;  %s1603_s23 = sphi %s1654_s23, %s21_s23   ;;  %s1599_s22 = sphi %s1652_s22, %s2348_s22   ;;  %s1595_s21 = sphi %s1650_s21, %s2347_s21   ;;  %s1591_s20 = sphi %s1648_s20, %s2346_s20   ;;  %s1587_s19 = sphi %s1646_s19, %s2345_s19   ;;  %s1583_s18 = sphi %s1644_s18, %s2344_s18  }
   0x7   : > { %s33_s26 = sadd.s32 1, %s1599_s22  ;;  %s42_s27 = sadd.s32 1, %s1591_s20 }
   0x8   : > { %p35_p0 = scmp.ge.s32.totalorder %s33_s26, 2  ;;  %p49_p1 = scmp.ne.s32.totalorder %s1591_s20, %s1587_s19 }
   0x9   : > { %p50_p2 = scmp.eq.s32.totalorder %s1603_s23, 0  ;;  %p55_p3 = scmp.ne.s32.totalorder %s1587_s19, %s1583_s18 }
   0xa   : > { %s2350_s26 = smov (%p35_p0, %s33_s26), 0  ;;  %p56_p5 = scmp.eq.s32.totalorder %s1047_s24, 0 }
   0xb   : > { %p1685_p4 = por %p50_p2, %p49_p1  ;;  %s37_s29 = ssub.s32 %s1599_s22, %s2350_s26 }
   0xc   : > { %p165_p6 = scmp.eq.s32.totalorder %s1047_s24, 1  ;;  %p40_p7 = scmp.eq.s32.totalorder %s37_s29, 0 }
   0xd   : > { %p1691_p8 = por %p56_p5, %p55_p3  ;;  %p171_p10 = scmp.eq.s32.totalorder %s1048_s25, 1 }
   0xe   : > { %p1695_p9 = por %p165_p6, %p49_p1  ;;  %p1258_p13 = scmp.lt.s32.totalorder %s1603_s23, 2 }
   0xf   : > { %s1700_s7 = scalar_select %p40_p7, %s1591_s20, %s42_s27  }
  0x10   : > { %s2331_s6 = scalar_select %p1695_p9, 1, 0 }
  0x11   : > { %p1702_p11 = por %p171_p10, %p55_p3  ;;  %s203_s9 = sand.u32 1, %s1591_s20  }
  0x12   : > { %s1051_s10 = sshll.u32 %s203_s9, 6  ;;  %s1142_s11 = sshll.u32 %s1599_s22, 10 }
  0x13   : > { %s2332_s8 = scalar_select %p1702_p11, 1, 0 }
  0x14   : > { %s1713_s14 = scalar_lea.hbm %s2322_s0, %s1142_s11  ;;  %s207_s15 = scalar_lea.vmem [#allocation4], %s1051_s10 }
  0x15   : > { %s216_s16 = sshll.u32 %s207_s15, 4  ;;  %p1719_p0 = pnand %p1258_p13, %p1685_p4  ;;  %s1715_s16 = int_to_ptr.vmem [resolvable:$true] %s216_s16 }
  0x16   : > { %s1724_s24 = scalar_lea.sflag [#allocation5], %s203_s9  ;;  %s1491_s25 = scalar_lea.hbm %s1713_s14, 1024 }
  0x17   : > { %p1492_p2 = scmp.ne.s32.totalorder %s1713_s14, %s1491_s25  ;;  %p1493_p3 = pneg %p1719_p0 }
  0x18   : > { %s1496_s28 = scalar_lea.hbm %s2322_s0, 2048  ;;  %p1497_p4 = scmp.lt.u32.totalorder %s1713_s14, %s2322_s0 }
  0x19   : > { %p1494_p5 = pnand %p1493_p3, %p1492_p2  ;;  %p1498_p7 = scmp.lt.u32.totalorder %s1496_s28, %s1491_s25 }
  0x1a   : > { %p1500_p13 = scmp.lt.u32.totalorder %s1491_s25, %s1713_s14 }
  0x1b   : > { %p1495_p6 = pneg %p1494_p5  ;;  %p1499_p10 = por %p1498_p7, %p1497_p4 }
  0x1d   : > { %p1501_p12 = por %p1500_p13, %p1499_p10 }
  0x1f   : > { %p1502_p1 = pnand %p1501_p12, %p1495_p6 }
  0x21   : > { %1505 = shalt.err (!%p1502_p1)
}
  0x22   : > { %s1506_s9 = scalar_lea.vmem %s1715_s16, 1024  ;;  %s1605_s12 = smov [#allocation4]  }
  0x23   : > { %p1507_p2 = scmp.ne.s32.totalorder %s1715_s16, %s1506_s9  ;;  %s1511_s13 = sshll.u32 %s1605_s12, 4  ;;  %s1512_s13 = int_to_ptr.vmem [resolvable:$false] %s1511_s13 }
  0x24   : > { %s1513_s15 = scalar_lea.vmem %s1512_s13, 2048  ;;  %p1514_p9 = scmp.lt.s32.totalorder %s1715_s16, %s1512_s13 }
  0x25   : > { %p1509_p5 = pnand %p1507_p2, %p1493_p3  ;;  %p1515_p4 = scmp.lt.s32.totalorder %s1513_s15, %s1506_s9 }
  0x27   : > { %p1510_p11 = pneg %p1509_p5  ;;  %p1516_p7 = por %p1515_p4, %p1514_p9 }
  0x29   : > { %p1517_p10 = pnand %p1516_p7, %p1510_p11 }
  0x2b   : > { %1520 = shalt.err (!%p1517_p10)
}
  0x2c   : > { %s1606_s25 = smov 256   ;;  %s1607_s27 = smov 16  }
  0x2d   : > { %1253 = dma.hbm_to_vmem [thread:$0]  (!%p1719_p0), %s1713_s14, 1024, %s1715_s16, %s1724_s24, %s1606_s25, %s1606_s25, %s1607_s27  }
  0x2e   : > { %p224_p12 = scmp.lt.s32.totalorder %s1603_s23, 3  ;;  %p2334_p1 = scmp.ge.s32.totalorder %s1603_s23, 1 }
  0x30   : > { %p225_p3 = pnand %p2334_p1, %p224_p12 }
  0x31   : > { %s1756_s29 = sand.u32 (!%p225_p3), 1, %s1587_s19  }
  0x32   : > { %228 = sbr.rel (%p225_p3) target bundleno = 1154 (0x482), region = 40  ;;  %s1055_s28 = sshll.u32 (!%p225_p3), %s1756_s29, 6 }
  0x33   : > { %s231_s10 = scalar_lea.sflag (!%p225_p3), [#allocation5], %s1756_s29  ;;  %s1762_s11 = scalar_lea.vmem (!%p225_p3), [#allocation4], %s1055_s28 }
  0x39   : > { %1574 = dma.done.wait (%p1691_p8), %s231_s10, 1024  }
  0x3a   : > { %1576 = vsyncadd (%p1691_p8), %s231_s10, 4294966272  ;;  %v287_v0 = vld [vmem:[%s1762_s11 + $0x20] sm:$0xff]  ;;  %v289_v1 = vld [vmem:[%s1762_s11 + $0x30] sm:$0xff]  ;;  %s1608_s30 = smov 16   ;;  %v275_v52 = vlaneseq  ;;  %s1609_s14 = smov 1  }
  0x3b   : > { %v283_v2 = vld [vmem:[%s1762_s11] sm:$0xff]  ;;  %v303_v3 = vmin.f32 %v287_v0, 0.0  ;;  %v305_v4 = vmin.f32 %v289_v1, 0.0  ;;  %v285_v5 = vld [vmem:[%s1762_s11 + $0x10] sm:$0xff]  ;;  %v288_v6 = vld [vmem:[%s1762_s11 + $0x28] sm:$0xff]  ;;  %vm295_vm0 = vcmp.gt.f32.partialorder %v287_v0, 0.0 }
  0x3c   : > { %v299_v7 = vmin.f32 %v283_v2, 0.0  ;;  %v301_v8 = vmin.f32 %v285_v5, 0.0  ;;  %v290_v9 = vld [vmem:[%s1762_s11 + $0x38] sm:$0xff]  ;;  %v1775_v10 = vld [vmem:[%s1762_s11 + $0x8] sm:$0xff]  ;;  %v304_v15 = vmin.f32 %v288_v6, 0.0  ;;  %vm297_vm1 = vcmp.gt.f32.partialorder %v289_v1, 0.0 }
  0x3d   : > { %v315_v11 = vmul.f32 1.442695, %v303_v3  ;;  %v319_v12 = vmul.f32 1.442695, %v305_v4  ;;  %v306_v16 = vmin.f32 %v290_v9, 0.0  ;;  %v286_v17 = vld [vmem:[%s1762_s11 + $0x18] sm:$0xff] }
  0x3e   : > { %v307_v13 = vmul.f32 1.442695, %v299_v7  ;;  %v311_v14 = vmul.f32 1.442695, %v301_v8  ;;  %v300_v18 = vmin.f32 %v1775_v10, 0.0  ;;  %v302_v21 = vmin.f32 %v286_v17, 0.0 }
  0x3f   : > { %1437 = vpow2.f32 %v315_v11  ;;  %v317_v19 = vmul.f32 1.442695, %v304_v15  ;;  %v321_v20 = vmul.f32 1.442695, %v306_v16  ;;  %vm291_vm2 = vcmp.gt.f32.partialorder %v283_v2, 0.0  ;;  %s2245_s13 = scalar_lea.vmem [#allocation7], %s1055_s28 }
  0x40   : > { %1439 = vpow2.f32 %v319_v12  ;;  %v309_v22 = vmul.f32 1.442695, %v300_v18  ;;  %v313_v23 = vmul.f32 1.442695, %v302_v21  ;;  %vm293_vm3 = vcmp.gt.f32.partialorder %v285_v5, 0.0  ;;  %s1143_s28 = sshll.u32 %s1595_s21, 10 }
  0x41   : > { %1441 = vpow2.f32 %v307_v13  ;;  %vm296_vm4 = vcmp.gt.f32.partialorder %v288_v6, 0.0  ;;  %vm298_vm5 = vcmp.gt.f32.partialorder %v290_v9, 0.0  ;;  %vm292_vm6 = vcmp.gt.f32.partialorder %v1775_v10, 0.0  ;;  %s960_s15 = sshll.u32 %s2245_s13, 4  ;;  %s2267_s10 = scalar_lea.hbm %s2327_s5, %s1143_s28  ;;  %s2270_s15 = int_to_ptr.vmem [resolvable:$true] %s960_s15 }
  0x42   : > { %1443 = vpow2.f32 %v311_v14  ;;  %vm294_vm7 = vcmp.gt.f32.partialorder %v286_v17, 0.0  ;;  %v1812_v54 = vand.u32 127, %v275_v52  ;;  %s945_s21 = scalar_lea.sflag [#allocation6], %s1756_s29  ;;  %s1521_s16 = scalar_lea.vmem %s2270_s15, 1024 }
  0x43   : > { %1445 = vpow2.f32 %v317_v19  ;;  %p1522_p8 = scmp.ne.s32.totalorder %s2270_s15, %s1521_s16  ;;  %p2341_p9 = scmp.ne.s32.totalorder %s2331_s6, 0 }
  0x44   : > { %1447 = vpow2.f32 %v321_v20  ;;  %vm282_vm8 = vcmp.lt.s32.totalorder %v1812_v54, 16  ;;  %vm393_vm9 = vcmp.lt.s32.totalorder %v1812_v54, 1  ;;  %s1612_s17 = smov [#allocation7]  }
  0x45   : > { %1449 = vpow2.f32 %v309_v22  ;;  %vm1146_vm14 = vmneg %vm282_vm8  ;;  %p1523_p11 = pnand %p1522_p8, %p2341_p9  ;;  %s1525_s24 = sshll.u32 %s1612_s17, 4  ;;  %s1526_s24 = int_to_ptr.vmem [resolvable:$false] %s1525_s24 }
  0x46   : > { %1451 = vpow2.f32 %v313_v23  ;;  %v1610_v23 = vmov 0.0   ;;  %vm1934_vm15 = vmpackc.low %vm1146_vm14, %vm1146_vm14  ;;  %s1527_s9 = scalar_lea.vmem %s1526_s24, 2048  ;;  %p1528_p6 = scmp.lt.s32.totalorder %s2270_s15, %s1526_s24 }
  0x47   : > { %538 = vmatprep.mubr.f32.mxu0 %v1610_v23  ;;  %831 = vmatprep.mubr.f32.mxu1 %v1610_v23  ;;  %p1524_p0 = pneg %p1523_p11  ;;  %p1529_p13 = scmp.lt.s32.totalorder %s1527_s9, %s1521_s16 }
  0x49   : > { %v1438_v24 = vpop.eup %1437  ;;  %p1530_p2 = por %p1529_p13, %p1528_p6 }
  0x4a   : > { %v1440_v25 = vpop.eup %1439  ;;  %v1061_v26 = vadd.f32 -1.0, %v1438_v24  ;;  %v450_v24 = vld [vmem:[%s2324_s2] sm:$0xff] }
  0x4b   : > { %v1442_v27 = vpop.eup %1441  ;;  %v1063_v28 = vadd.f32 -1.0, %v1440_v25  ;;  %v451_v25 = vld [vmem:[%s2324_s2 + $0x8] sm:$0xff]  ;;  %p1531_p5 = pnand %p1530_p2, %p1524_p0 }
  0x4c   : > { %v1444_v29 = vpop.eup %1443  ;;  %v1779_v30 = vsel %vm295_vm0, %v287_v0, %v1061_v26  ;;  %v1057_v31 = vadd.f32 -1.0, %v1442_v27  ;;  %v1611_v26 = vmov 0   ;;  %v452_v27 = vld [vmem:[%s2324_s2 + $0x10] sm:$0xff] }
  0x4d   : > { %v1446_v32 = vpop.eup %1445  ;;  %v1781_v33 = vsel %vm297_vm1, %v289_v1, %v1063_v28  ;;  %v1059_v34 = vadd.f32 -1.0, %v1444_v29  ;;  %1375 = vset.pattern.permute.xlu0 %v1611_v26  ;;  %1376 = vset.pattern.permute.xlu1 %v1611_v26  ;;  %v453_v28 = vld [vmem:[%s2324_s2 + $0x18] sm:$0xff]  ;;  %v277_v29 = vadd.s32 128, %v1812_v54 }
  0x4e   : > { %v1448_v35 = vpop.eup %1447  ;;  %v1785_v36 = vpack.i.bf16 %v1781_v33, %v1779_v30  ;;  %v1787_v37 = vsel %vm291_vm2, %v283_v2, %v1057_v31  ;;  %v1062_v38 = vadd.f32 -1.0, %v1446_v32  ;;  %v278_v32 = vand.u32 15, %v1812_v54  ;;  %v711_v54 = vld [vmem:[%s2325_s3] sm:$0xff] }
  0x4f   : > { %v1450_v39 = vpop.eup %1449  ;;  %v1789_v40 = vsel %vm293_vm3, %v285_v5, %v1059_v34  ;;  %v1064_v41 = vadd.f32 -1.0, %v1448_v35  ;;  %v279_v31 = vand.u32 15, %v277_v29 }
  0x50   : > { %v1452_v42 = vpop.eup %1451  ;;  %1326 = vrot.lane.b32.xlu1 %v1785_v36, %s1608_s30  ;;  %v1315_v43 = vpack.i.bf16 %v1789_v40, %v1787_v37  ;;  %v1796_v44 = vsel %vm296_vm4, %v288_v6, %v1062_v38  ;;  %v1058_v45 = vadd.f32 -1.0, %v1450_v39  ;;  %vm1145_vm11 = vcmp.ne.s32.totalorder %v278_v32, 0 }
  0x51   : > { %v1798_v46 = vsel %vm298_vm5, %v290_v9, %v1064_v41  ;;  %v1060_v47 = vadd.f32 -1.0, %v1452_v42  ;;  %vm1144_vm10 = vcmp.ne.s32.totalorder %v279_v31, 0  ;;  %vm1909_vm13 = vmpackc.low %vm1145_vm11, %vm1145_vm11 }
  0x52   : > { %1316 = vrot.lane.b32.xlu0 %v1315_v43, %s1608_s30  ;;  %v1330_v48 = vpack.i.bf16 %v1798_v46, %v1796_v44  ;;  %v1804_v49 = vsel %vm292_vm6, %v1775_v10, %v1058_v45  ;;  %vm1901_vm12 = vmpackc.low %vm1144_vm10, %vm1144_vm10 }
  0x53   : > { %v1806_v50 = vsel %vm294_vm7, %v286_v17, %v1060_v47  ;;  %v712_v47 = vld [vmem:[%s2325_s3 + $0x8] sm:$0xff] }
  0x54   : > { %1331 = vrot.lane.b32.xlu1 %v1330_v48, %s1608_s30  ;;  %v1320_v51 = vpack.i.bf16 %v1806_v50, %v1804_v49 }
  0x56   : > { %1321 = vrot.lane.b32.xlu0 %v1320_v51, %s1608_s30 }
  0xc2   : > { %v1327_v53 = vpop.permute.xlu1 %1326 }
  0xc3   : > { %v1329_v56 = vunpack.i.h.bf16 %v1327_v53  ;;  %v1328_v57 = vunpack.i.l.bf16 %v1327_v53 }
  0xc4   : > { %v1317_v55 = vpop.permute.xlu0 %1316 }
  0xc5   : > { %v1319_v61 = vunpack.i.h.bf16 %v1317_v55  ;;  %v1318_v62 = vunpack.i.l.bf16 %v1317_v55 }
  0xc6   : > { %v1332_v58 = vpop.permute.xlu1 %1331 }
  0xc7   : > { %v1334_v59 = vunpack.i.h.bf16 %v1332_v58  ;;  %v1333_v60 = vunpack.i.l.bf16 %v1332_v58  ;;  %v713_v58 = vld [vmem:[%s2325_s3 + $0x10] sm:$0xff] }
  0xc8   : > { %v1322_v63 = vpop.permute.xlu0 %1321 }
  0xc9   : > { %v1324_v0 = vunpack.i.h.bf16 %v1322_v63  ;;  %v1323_v1 = vunpack.i.l.bf16 %v1322_v63  ;;  %v1817_v2 = vsel %vm282_vm8, %v1328_v57, %v1333_v60  ;;  %v1821_v3 = vsel %vm282_vm8, %v1329_v56, %v1334_v59 }
  0xca   : > { %v1825_v4 = vsel %vm282_vm8, %v1333_v60, %v1328_v57  ;;  %v1829_v5 = vsel %vm282_vm8, %v1334_v59, %v1329_v56  ;;  %v1179_v6 = vpack.c.bf16 %v1821_v3, %v1817_v2  ;;  %v1350_v21 = vpack.i.bf16 %v1821_v3, %v1817_v2 }
  0xcb   : > { %v1835_v7 = vsel %vm282_vm8, %v1318_v62, %v1323_v1  ;;  %v1839_v8 = vsel %vm282_vm8, %v1319_v61, %v1324_v0  ;;  %v1843_v9 = vsel %vm282_vm8, %v1323_v1, %v1318_v62  ;;  %v1847_v11 = vsel %vm282_vm8, %v1324_v0, %v1319_v61 }
  0xcc   : > { %v1335_v12 = vpack.i.bf16 %v1839_v8, %v1835_v7  ;;  %v369_v13 = vsel %vm282_vm8, 0.0, %v1843_v9  ;;  %v370_v14 = vsel %vm282_vm8, 0.0, %v1847_v11  ;;  %v1176_v15 = vpack.c.bf16 %v1847_v11, %v1843_v9 }
  0xcd   : > { %v1340_v16 = vpack.i.bf16 %v370_v14, %v369_v13  ;;  %v1181_v17 = vpack.c.bf16 %v1829_v5, %v1825_v4  ;;  %v371_v18 = vsel %vm282_vm8, 0.0, %v1825_v4  ;;  %v372_v19 = vsel %vm282_vm8, 0.0, %v1829_v5 }
  0xce   : > { %1336 = vrot.lane.b32.xlu1 %v1335_v12, %s1609_s14  ;;  %v1174_v20 = vpack.c.bf16 %v1839_v8, %v1835_v7  ;;  %v1345_v22 = vpack.i.bf16 %v372_v19, %v371_v18  ;;  %v1196_v4 = vpack.c.bf16 %v1806_v50, %v1804_v49  ;;  %v1198_v5 = vpack.c.bf16 %v1789_v40, %v1787_v37  ;;  %v446_v49 = vld [vmem:[%s2323_s1] sm:$0xff]  ;;  %v447_v37 = vld [vmem:[%s2323_s1 + $0x8] sm:$0xff] }
  0xcf   : > { %1341 = vrot.lane.b32.xlu0 %v1340_v16, %s1609_s14 }
  0xd2   : > { %1351 = vrot.lane.b32.xlu1 %v1350_v21, %s1609_s14 }
  0xd3   : > { %1346 = vrot.lane.b32.xlu0 %v1345_v22, %s1609_s14 }
  0xd6   : > { %1361 = vrot.lane.b32.xlu1 %v1320_v51, %s1609_s14 }
  0xd7   : > { %1356 = vrot.lane.b32.xlu0 %v1315_v43, %s1609_s14 }
  0xda   : > { %1371 = vrot.lane.b32.xlu1 %v1330_v48, %s1609_s14 }
  0xdb   : > { %1366 = vrot.lane.b32.xlu0 %v1785_v36, %s1609_s14 }
  0xde   : > { %461 = vperm.xlu1 %1376, %v451_v25  }
  0xdf   : > { %456 = vperm.xlu0 %1375, %v450_v24   ;;  %v714_v24 = vld [vmem:[%s2325_s3 + $0x18] sm:$0xff] }
  0xe2   : > { %466 = vperm.xlu1 %1376, %v452_v27  }
  0xe3   : > { %471 = vperm.xlu0 %1375, %v453_v28  }
 0x140   : > { %v1337_v34 = vpop.permute.xlu1 %1336 }
 0x141   : > { %v1339_v35 = vunpack.i.h.bf16 %v1337_v34  ;;  %v1338_v36 = vunpack.i.l.bf16 %v1337_v34  ;;  %v1342_v38 = vpop.permute.xlu0 %1341 }
 0x142   : > { %v1344_v39 = vunpack.i.h.bf16 %v1342_v38  ;;  %v1343_v41 = vunpack.i.l.bf16 %v1342_v38 }
 0x144   : > { %v1352_v42 = vpop.permute.xlu1 %1351  ;;  %v430_v43 = vsel %vm393_vm9, %v1343_v41, %v1338_v36  ;;  %v431_v45 = vsel %vm393_vm9, %v1344_v39, %v1339_v35  ;;  %v434_v48 = vsel %vm393_vm9, %v1338_v36, %v1343_v41  ;;  %v435_v51 = vsel %vm393_vm9, %v1339_v35, %v1344_v39 }
 0x145   : > { %v1354_v52 = vunpack.i.h.bf16 %v1352_v42  ;;  %v1353_v53 = vunpack.i.l.bf16 %v1352_v42  ;;  %v1347_v55 = vpop.permute.xlu0 %1346  ;;  %v1162_v56 = vpack.c.bf16 %v431_v45, %v430_v43  ;;  %v1165_v57 = vpack.c.bf16 %v435_v51, %v434_v48 }
 0x146   : > { %v1349_v59 = vunpack.i.h.bf16 %v1347_v55  ;;  %v1348_v60 = vunpack.i.l.bf16 %v1347_v55  ;;  %v1202_v35 = vpack.c.bf16 %v1781_v33, %v1779_v30  ;;  %v448_v30 = vld [vmem:[%s2323_s1 + $0x10] sm:$0xff]  ;;  %v449_v33 = vld [vmem:[%s2323_s1 + $0x18] sm:$0xff] }
 0x147   : > { %1164 = vmatprep.subr.msk.bf16.mxu0 %vm1901_vm12, %v1162_v56 }
 0x148   : > { %v432_v61 = vsel %vm393_vm9, %v1348_v60, %v1353_v53  ;;  %v433_v62 = vsel %vm393_vm9, %v1349_v59, %v1354_v52  ;;  %v436_v63 = vsel %vm393_vm9, %v1353_v53, %v1348_v60  ;;  %v437_v0 = vsel %vm393_vm9, %v1354_v52, %v1349_v59  ;;  %1167 = vmatpush1.bf16.msk.msra.mxu0 %vm1909_vm13, %v1165_v57  ;;  %v1362_v1 = vpop.permute.xlu1 %1361 }
 0x149   : > { %v1168_v12 = vpack.c.bf16 %v433_v62, %v432_v61  ;;  %v1171_v13 = vpack.c.bf16 %v437_v0, %v436_v63  ;;  %v1357_v14 = vpop.permute.xlu0 %1356  ;;  %v1364_v16 = vunpack.i.h.bf16 %v1362_v1  ;;  %v1363_v18 = vunpack.i.l.bf16 %v1362_v1 }
 0x14a   : > { %v1359_v19 = vunpack.i.h.bf16 %v1357_v14  ;;  %v1358_v21 = vunpack.i.l.bf16 %v1357_v14 }
 0x14b   : > { %1170 = vmatprep.subr.msk.bf16.mxu0 %vm1901_vm12, %v1168_v12 }
 0x14c   : > { %1173 = vmatpush1.bf16.msk.msra.mxu0 %vm1909_vm13, %v1171_v13  ;;  %v1372_v22 = vpop.permute.xlu1 %1371  ;;  %v395_v25 = vsel %vm393_vm9, %v1359_v19, %v1364_v16  ;;  %v394_v26 = vsel %vm393_vm9, %v1358_v21, %v1363_v18  ;;  %v399_v7 = vsel %vm393_vm9, %v1364_v16, %v1359_v19  ;;  %v398_v8 = vsel %vm393_vm9, %v1363_v18, %v1358_v21 }
 0x14d   : > { %1175 = vmatprep.subr.bf16.mxu0 %v1174_v20  ;;  %v1367_v27 = vpop.permute.xlu0 %1366  ;;  %v1374_v31 = vunpack.i.h.bf16 %v1372_v22  ;;  %v1373_v32 = vunpack.i.l.bf16 %v1372_v22  ;;  %v1184_v20 = vpack.c.bf16 %v395_v25, %v394_v26  ;;  %v1187_v11 = vpack.c.bf16 %v399_v7, %v398_v8 }
 0x14e   : > { %v1369_v28 = vunpack.i.h.bf16 %v1367_v27  ;;  %v1368_v29 = vunpack.i.l.bf16 %v1367_v27 }
 0x150   : > { %1178 = vmatpush1.bf16.msk.msra.mxu0 %vm1934_vm15, %v1176_v15  ;;  %v397_v34 = vsel %vm393_vm9, %v1369_v28, %v1374_v31  ;;  %v396_v9 = vsel %vm393_vm9, %v1368_v29, %v1373_v32  ;;  %v401_v15 = vsel %vm393_vm9, %v1374_v31, %v1369_v28  ;;  %v400_v2 = vsel %vm393_vm9, %v1373_v32, %v1368_v29 }
 0x151   : > { %1180 = vmatprep.subr.bf16.mxu0 %v1179_v6  ;;  %v1190_v3 = vpack.c.bf16 %v397_v34, %v396_v9  ;;  %v1193_v6 = vpack.c.bf16 %v401_v15, %v400_v2 }
 0x154   : > { %1183 = vmatpush1.bf16.msk.msra.mxu0 %vm1934_vm15, %v1181_v17  ;;  %v1200_v17 = vpack.c.bf16 %v1798_v46, %v1796_v44 }
 0x155   : > { %1186 = vmatprep.subr.msk.bf16.mxu0 %vm1901_vm12, %v1184_v20 }
 0x158   : > { %1189 = vmatpush1.bf16.msk.msra.mxu0 %vm1909_vm13, %v1187_v11 }
 0x159   : > { %1192 = vmatprep.subr.msk.bf16.mxu0 %vm1901_vm12, %v1190_v3 }
 0x15c   : > { %1195 = vmatpush1.bf16.msk.msra.mxu0 %vm1909_vm13, %v1193_v6 }
 0x15d   : > { %1197 = vmatprep.subr.bf16.mxu0 %v1196_v4  ;;  %v462_v46 = vpop.permute.xlu1 %461 }
 0x15e   : > { %v457_v40 = vpop.permute.xlu0 %456 }
 0x160   : > { %1199 = vmatpush1.bf16.msra.mxu0 %v1198_v5 }
 0x161   : > { %1201 = vmatprep.subr.bf16.mxu0 %v1200_v17  ;;  %v467_v53 = vpop.permute.xlu1 %466 }
 0x162   : > { %v472_v1 = vpop.permute.xlu0 %471 }
 0x164   : > { %1203 = vmatpush1.bf16.msra.mxu0 %v1202_v35 }
 0x167   : > { %539 = vmatmul.mubr.f32.vlgmr.msra.gmra.mrb[0].mxu0 %v446_v49 }
 0x168   : > { %544 = vmatprep.mubr.f32.mxu0 %v1610_v23 }
 0x16b   : > { %545 = vmatmul.mubr.f32.gmra.mrb[2].mxu0 %v447_v37 }
 0x16c   : > { %550 = vmatprep.mubr.f32.mxu0 %v1610_v23 }
 0x16f   : > { %551 = vmatmul.mubr.f32.gmra.mrb[4].mxu0 %v448_v30 }
 0x170   : > { %556 = vmatprep.mubr.f32.mxu0 %v1610_v23 }
 0x173   : > { %557 = vmatmul.mubr.f32.gmra.mrb[6].mxu0 %v449_v33 }
 0x23a   : > { %v540_v44 = vpop.f32.mrb[0].mxu0 }
 0x23b   : > { %v541_v50 = vadd.f32 %v540_v44, %v457_v40  ;;  %v542_v36 = vpop.f32.mrb[1].mxu0 }
 0x23c   : > { %v543_v38 = vadd.f32 %v542_v36, %v457_v40 }
 0x23d   : > { %v571_v39 = vmin.f32 %v541_v50, 0.0  ;;  %vm563_vm0 = vcmp.gt.f32.partialorder %v541_v50, 0.0 }
 0x23e   : > { %v572_v41 = vmin.f32 %v543_v38, 0.0  ;;  %v546_v42 = vpop.f32.mrb[2].mxu0  ;;  %vm564_vm1 = vcmp.gt.f32.partialorder %v543_v38, 0.0 }
 0x23f   : > { %v579_v43 = vmul.f32 1.442695, %v571_v39  ;;  %v547_v45 = vadd.f32 %v546_v42, %v462_v46  ;;  %v548_v48 = vpop.f32.mrb[3].mxu0 }
 0x240   : > { %v581_v51 = vmul.f32 1.442695, %v572_v41  ;;  %v549_v52 = vadd.f32 %v548_v48, %v462_v46 }
 0x241   : > { %1453 = vpow2.f32 %v579_v43  ;;  %v573_v55 = vmin.f32 %v547_v45, 0.0  ;;  %vm565_vm2 = vcmp.gt.f32.partialorder %v547_v45, 0.0 }
 0x242   : > { %1455 = vpow2.f32 %v581_v51  ;;  %v574_v56 = vmin.f32 %v549_v52, 0.0  ;;  %v552_v57 = vpop.f32.mrb[4].mxu0  ;;  %vm566_vm3 = vcmp.gt.f32.partialorder %v549_v52, 0.0 }
 0x243   : > { %v583_v59 = vmul.f32 1.442695, %v573_v55  ;;  %v553_v60 = vadd.f32 %v552_v57, %v467_v53  ;;  %v554_v61 = vpop.f32.mrb[5].mxu0 }
 0x244   : > { %v585_v62 = vmul.f32 1.442695, %v574_v56  ;;  %v555_v63 = vadd.f32 %v554_v61, %v467_v53 }
 0x245   : > { %1457 = vpow2.f32 %v583_v59  ;;  %v575_v0 = vmin.f32 %v553_v60, 0.0  ;;  %vm567_vm4 = vcmp.gt.f32.partialorder %v553_v60, 0.0 }
 0x246   : > { %1459 = vpow2.f32 %v585_v62  ;;  %v576_v12 = vmin.f32 %v555_v63, 0.0  ;;  %v558_v13 = vpop.f32.mrb[6].mxu0  ;;  %vm568_vm5 = vcmp.gt.f32.partialorder %v555_v63, 0.0 }
 0x247   : > { %v587_v14 = vmul.f32 1.442695, %v575_v0  ;;  %v559_v16 = vadd.f32 %v558_v13, %v472_v1  ;;  %v560_v18 = vpop.f32.mrb[7].mxu0 }
 0x248   : > { %v589_v19 = vmul.f32 1.442695, %v576_v12  ;;  %v561_v21 = vadd.f32 %v560_v18, %v472_v1 }
 0x249   : > { %1461 = vpow2.f32 %v587_v14  ;;  %v577_v22 = vmin.f32 %v559_v16, 0.0  ;;  %vm569_vm6 = vcmp.gt.f32.partialorder %v559_v16, 0.0 }
 0x24a   : > { %1463 = vpow2.f32 %v589_v19  ;;  %v578_v25 = vmin.f32 %v561_v21, 0.0  ;;  %vm570_vm7 = vcmp.gt.f32.partialorder %v561_v21, 0.0 }
 0x24b   : > { %v1454_v26 = vpop.eup %1453  ;;  %v591_v27 = vmul.f32 1.442695, %v577_v22 }
 0x24c   : > { %v1456_v28 = vpop.eup %1455  ;;  %v593_v29 = vmul.f32 1.442695, %v578_v25  ;;  %v1097_v31 = vadd.f32 -1.0, %v1454_v26 }
 0x24d   : > { %1465 = vpow2.f32 %v591_v27  ;;  %v1098_v32 = vadd.f32 -1.0, %v1456_v28 }
 0x24e   : > { %1467 = vpow2.f32 %v593_v29  ;;  %v1998_v9 = vsel %vm563_vm0, %v541_v50, %v1097_v31 }
 0x24f   : > { %v1458_v7 = vpop.eup %1457  ;;  %v2000_v11 = vsel %vm564_vm1, %v543_v38, %v1098_v32 }
 0x250   : > { %v1460_v8 = vpop.eup %1459  ;;  %v1099_v20 = vadd.f32 -1.0, %v1458_v7 }
 0x251   : > { %v1100_v34 = vadd.f32 -1.0, %v1460_v8 }
 0x252   : > { %v2002_v15 = vsel %vm565_vm2, %v547_v45, %v1099_v20  ;;  %v724_v20 = vld [vmem:[%s2326_s4 + $0x28] sm:$0xff] }
 0x253   : > { %v1462_v2 = vpop.eup %1461  ;;  %v2004_v3 = vsel %vm566_vm3, %v549_v52, %v1100_v34  ;;  %v2008_v6 = vpack.i.bf16 %v2002_v15, %v1998_v9  ;;  %v1240_v4 = vpack.c.bf16 %v2002_v15, %v1998_v9  ;;  %v723_v34 = vld [vmem:[%s2326_s4 + $0x20] sm:$0xff]  ;;  %v717_v15 = vld [vmem:[%s2325_s3 + $0x30] sm:$0xff] }
 0x254   : > { %v1464_v5 = vpop.eup %1463  ;;  %v1382_v17 = vpack.i.bf16 %v2004_v3, %v2000_v11  ;;  %v1238_v35 = vpack.c.bf16 %v2004_v3, %v2000_v11  ;;  %v1101_v49 = vadd.f32 -1.0, %v1462_v2  ;;  %v726_v2 = vld [vmem:[%s2326_s4 + $0x38] sm:$0xff]  ;;  %v715_v9 = vld [vmem:[%s2325_s3 + $0x20] sm:$0xff]  ;;  %v716_v11 = vld [vmem:[%s2325_s3 + $0x28] sm:$0xff] }
 0x255   : > { %1378 = vrot.lane.b32.xlu1 %v2008_v6, %s1608_s30  ;;  %v1102_v37 = vadd.f32 -1.0, %v1464_v5  ;;  %v720_v5 = vld [vmem:[%s2326_s4 + $0x8] sm:$0xff]  ;;  %v718_v3 = vld [vmem:[%s2325_s3 + $0x38] sm:$0xff] }
 0x256   : > { %1383 = vrot.lane.b32.xlu0 %v1382_v17, %s1608_s30  ;;  %v2019_v46 = vsel %vm567_vm4, %v553_v60, %v1101_v49  ;;  %v722_v49 = vld [vmem:[%s2326_s4 + $0x18] sm:$0xff] }
 0x257   : > { %v1466_v30 = vpop.eup %1465  ;;  %v2021_v50 = vsel %vm568_vm5, %v555_v63, %v1102_v37  ;;  %v721_v37 = vld [vmem:[%s2326_s4 + $0x10] sm:$0xff] }
 0x258   : > { %v1468_v33 = vpop.eup %1467  ;;  %v1103_v40 = vadd.f32 -1.0, %v1466_v30 }
 0x259   : > { %v1104_v44 = vadd.f32 -1.0, %v1468_v33 }
 0x25a   : > { %v2023_v36 = vsel %vm569_vm6, %v559_v16, %v1103_v40 }
 0x25b   : > { %v2025_v38 = vsel %vm570_vm7, %v561_v21, %v1104_v44  ;;  %v1387_v39 = vpack.i.bf16 %v2023_v36, %v2019_v46  ;;  %v1244_v41 = vpack.c.bf16 %v2023_v36, %v2019_v46 }
 0x25c   : > { %v1392_v42 = vpack.i.bf16 %v2025_v38, %v2021_v50  ;;  %v1242_v43 = vpack.c.bf16 %v2025_v38, %v2021_v50 }
 0x25d   : > { %1388 = vrot.lane.b32.xlu1 %v1387_v39, %s1608_s30 }
 0x25e   : > { %1393 = vrot.lane.b32.xlu0 %v1392_v42, %s1608_s30 }
 0x2c7   : > { %v1379_v45 = vpop.permute.xlu1 %1378 }
 0x2c8   : > { %v1381_v48 = vunpack.i.h.bf16 %v1379_v45  ;;  %v1380_v51 = vunpack.i.l.bf16 %v1379_v45  ;;  %v1384_v52 = vpop.permute.xlu0 %1383 }
 0x2c9   : > { %v1386_v53 = vunpack.i.h.bf16 %v1384_v52  ;;  %v1385_v55 = vunpack.i.l.bf16 %v1384_v52 }
 0x2cb   : > { %v2039_v56 = vsel %vm282_vm8, %v1380_v51, %v1385_v55  ;;  %v2043_v57 = vsel %vm282_vm8, %v1381_v48, %v1386_v53  ;;  %v2047_v59 = vsel %vm282_vm8, %v1385_v55, %v1380_v51  ;;  %v2051_v60 = vsel %vm282_vm8, %v1386_v53, %v1381_v48 }
 0x2cc   : > { %v1397_v61 = vpack.i.bf16 %v2043_v57, %v2039_v56  ;;  %v639_v62 = vsel %vm282_vm8, 0.0, %v2047_v59  ;;  %v640_v63 = vsel %vm282_vm8, 0.0, %v2051_v60  ;;  %v1218_v0 = vpack.c.bf16 %v2051_v60, %v2047_v59 }
 0x2cd   : > { %v1402_v1 = vpack.i.bf16 %v640_v63, %v639_v62  ;;  %v1216_v12 = vpack.c.bf16 %v2043_v57, %v2039_v56 }
 0x2ce   : > { %1398 = vrot.lane.b32.xlu0 %v1397_v61, %s1609_s14 }
 0x2cf   : > { %v1389_v13 = vpop.permute.xlu1 %1388  ;;  %1403 = vrot.lane.b32.xlu1 %v1402_v1, %s1609_s14 }
 0x2d0   : > { %v1391_v14 = vunpack.i.h.bf16 %v1389_v13  ;;  %v1390_v16 = vunpack.i.l.bf16 %v1389_v13  ;;  %v1394_v18 = vpop.permute.xlu0 %1393 }
 0x2d1   : > { %v1396_v19 = vunpack.i.h.bf16 %v1394_v18  ;;  %v1395_v21 = vunpack.i.l.bf16 %v1394_v18 }
 0x2d3   : > { %v2069_v22 = vsel %vm282_vm8, %v1390_v16, %v1395_v21  ;;  %v2073_v25 = vsel %vm282_vm8, %v1391_v14, %v1396_v19  ;;  %v2077_v26 = vsel %vm282_vm8, %v1395_v21, %v1390_v16  ;;  %v2081_v27 = vsel %vm282_vm8, %v1396_v19, %v1391_v14 }
 0x2d4   : > { %v1412_v28 = vpack.i.bf16 %v2073_v25, %v2069_v22  ;;  %v641_v29 = vsel %vm282_vm8, 0.0, %v2077_v26  ;;  %v642_v31 = vsel %vm282_vm8, 0.0, %v2081_v27  ;;  %v1223_v32 = vpack.c.bf16 %v2081_v27, %v2077_v26 }
 0x2d5   : > { %v1407_v7 = vpack.i.bf16 %v642_v31, %v641_v29  ;;  %v1221_v8 = vpack.c.bf16 %v2073_v25, %v2069_v22 }
 0x2d6   : > { %1413 = vrot.lane.b32.xlu0 %v1412_v28, %s1609_s14 }
 0x2d7   : > { %1408 = vrot.lane.b32.xlu1 %v1407_v7, %s1609_s14 }
 0x2da   : > { %1423 = vrot.lane.b32.xlu0 %v1382_v17, %s1609_s14  ;;  %v719_v17 = vld [vmem:[%s2326_s4] sm:$0xff] }
 0x2db   : > { %1418 = vrot.lane.b32.xlu1 %v2008_v6, %s1609_s14  ;;  %v725_v6 = vld [vmem:[%s2326_s4 + $0x30] sm:$0xff] }
 0x2de   : > { %1433 = vrot.lane.b32.xlu0 %v1392_v42, %s1609_s14 }
 0x2df   : > { %1428 = vrot.lane.b32.xlu1 %v1387_v39, %s1609_s14 }
 0x2e2   : > { %754 = vperm.xlu0 %1375, %v724_v20  }
 0x2e3   : > { %749 = vperm.xlu1 %1376, %v723_v34  }
 0x2e6   : > { %764 = vperm.xlu0 %1375, %v726_v2  }
 0x2e7   : > { %759 = vperm.xlu1 %1376, %v725_v6  }
 0x2ea   : > { %734 = vperm.xlu0 %1375, %v720_v5  }
 0x2eb   : > { %729 = vperm.xlu1 %1376, %v719_v17  }
 0x2ee   : > { %744 = vperm.xlu0 %1375, %v722_v49  }
 0x2ef   : > { %739 = vperm.xlu1 %1376, %v721_v37  }
 0x340   : > { %v1399_v30 = vpop.permute.xlu0 %1398 }
 0x341   : > { %v1401_v33 = vunpack.i.h.bf16 %v1399_v30  ;;  %v1400_v40 = vunpack.i.l.bf16 %v1399_v30  ;;  %v1404_v44 = vpop.permute.xlu1 %1403 }
 0x342   : > { %v1406_v39 = vunpack.i.h.bf16 %v1404_v44  ;;  %v1405_v42 = vunpack.i.l.bf16 %v1404_v44 }
 0x344   : > { %v695_v45 = vsel %vm393_vm9, %v1405_v42, %v1400_v40  ;;  %v696_v48 = vsel %vm393_vm9, %v1406_v39, %v1401_v33  ;;  %v699_v51 = vsel %vm393_vm9, %v1400_v40, %v1405_v42  ;;  %v700_v52 = vsel %vm393_vm9, %v1401_v33, %v1406_v39 }
 0x345   : > { %v1204_v53 = vpack.c.bf16 %v696_v48, %v695_v45  ;;  %v1207_v55 = vpack.c.bf16 %v700_v52, %v699_v51 }
 0x347   : > { %1206 = vmatprep.subr.msk.bf16.mxu1 %vm1901_vm12, %v1204_v53 }
 0x348   : > { %v1414_v61 = vpop.permute.xlu0 %1413  ;;  %1209 = vmatpush1.bf16.msk.msra.mxu1 %vm1909_vm13, %v1207_v55 }
 0x349   : > { %v1416_v62 = vunpack.i.h.bf16 %v1414_v61  ;;  %v1415_v63 = vunpack.i.l.bf16 %v1414_v61  ;;  %v1409_v1 = vpop.permute.xlu1 %1408 }
 0x34a   : > { %v1411_v13 = vunpack.i.h.bf16 %v1409_v1  ;;  %v1410_v14 = vunpack.i.l.bf16 %v1409_v1 }
 0x34c   : > { %v697_v16 = vsel %vm393_vm9, %v1410_v14, %v1415_v63  ;;  %v698_v18 = vsel %vm393_vm9, %v1411_v13, %v1416_v62  ;;  %v701_v19 = vsel %vm393_vm9, %v1415_v63, %v1410_v14  ;;  %v702_v21 = vsel %vm393_vm9, %v1416_v62, %v1411_v13  ;;  %v1424_v28 = vpop.permute.xlu0 %1423 }
 0x34d   : > { %v1210_v29 = vpack.c.bf16 %v698_v18, %v697_v16  ;;  %v1213_v31 = vpack.c.bf16 %v702_v21, %v701_v19  ;;  %v1419_v7 = vpop.permute.xlu1 %1418  ;;  %v1426_v20 = vunpack.i.h.bf16 %v1424_v28  ;;  %v1425_v34 = vunpack.i.l.bf16 %v1424_v28 }
 0x34e   : > { %v1421_v2 = vunpack.i.h.bf16 %v1419_v7  ;;  %v1420_v6 = vunpack.i.l.bf16 %v1419_v7 }
 0x34f   : > { %1212 = vmatprep.subr.msk.bf16.mxu1 %vm1901_vm12, %v1210_v29 }
 0x350   : > { %1215 = vmatpush1.bf16.msk.msra.mxu1 %vm1909_vm13, %v1213_v31  ;;  %v1434_v5 = vpop.permute.xlu0 %1433  ;;  %v663_v49 = vsel %vm393_vm9, %v1420_v6, %v1425_v34  ;;  %v664_v37 = vsel %vm393_vm9, %v1421_v2, %v1426_v20  ;;  %v667_v56 = vsel %vm393_vm9, %v1425_v34, %v1420_v6  ;;  %v668_v57 = vsel %vm393_vm9, %v1426_v20, %v1421_v2 }
 0x351   : > { %v1429_v17 = vpop.permute.xlu1 %1428  ;;  %1217 = vmatprep.subr.bf16.mxu1 %v1216_v12  ;;  %v1436_v30 = vunpack.i.h.bf16 %v1434_v5  ;;  %v1435_v33 = vunpack.i.l.bf16 %v1434_v5  ;;  %v1226_v12 = vpack.c.bf16 %v664_v37, %v663_v49  ;;  %v1229_v60 = vpack.c.bf16 %v668_v57, %v667_v56 }
 0x352   : > { %v1431_v40 = vunpack.i.h.bf16 %v1429_v17  ;;  %v1430_v44 = vunpack.i.l.bf16 %v1429_v17 }
 0x354   : > { %1220 = vmatpush1.bf16.msk.msra.mxu1 %vm1934_vm15, %v1218_v0  ;;  %v665_v39 = vsel %vm393_vm9, %v1430_v44, %v1435_v33  ;;  %v666_v59 = vsel %vm393_vm9, %v1431_v40, %v1436_v30  ;;  %v669_v0 = vsel %vm393_vm9, %v1435_v33, %v1430_v44  ;;  %v670_v22 = vsel %vm393_vm9, %v1436_v30, %v1431_v40 }
 0x355   : > { %1222 = vmatprep.subr.bf16.mxu1 %v1221_v8  ;;  %v1232_v25 = vpack.c.bf16 %v666_v59, %v665_v39  ;;  %v1235_v26 = vpack.c.bf16 %v670_v22, %v669_v0 }
 0x358   : > { %1225 = vmatpush1.bf16.msk.msra.mxu1 %vm1934_vm15, %v1223_v32 }
 0x359   : > { %1228 = vmatprep.subr.msk.bf16.mxu1 %vm1901_vm12, %v1226_v12 }
 0x35c   : > { %1231 = vmatpush1.bf16.msk.msra.mxu1 %vm1909_vm13, %v1229_v60 }
 0x35d   : > { %1234 = vmatprep.subr.msk.bf16.mxu1 %vm1901_vm12, %v1232_v25  ;;  %v1485_v25 = vld [vmem:[%s1762_s11] sm:$0xff] }
 0x360   : > { %1237 = vmatpush1.bf16.msk.msra.mxu1 %vm1909_vm13, %v1235_v26 }
 0x361   : > { %1239 = vmatprep.subr.bf16.mxu1 %v1238_v35  ;;  %v755_v48 = vpop.permute.xlu0 %754 }
 0x362   : > { %v750_v27 = vpop.permute.xlu1 %749 }
 0x364   : > { %1241 = vmatpush1.bf16.msra.mxu1 %v1240_v4 }
 0x365   : > { %1243 = vmatprep.subr.bf16.mxu1 %v1242_v43  ;;  %v765_v21 = vpop.permute.xlu0 %764 }
 0x366   : > { %v760_v63 = vpop.permute.xlu1 %759 }
 0x368   : > { %1245 = vmatpush1.bf16.msra.mxu1 %v1244_v41 }
 0x369   : > { %v735_v59 = vpop.permute.xlu0 %734 }
 0x36a   : > { %v730_v49 = vpop.permute.xlu1 %729 }
 0x36b   : > { %832 = vmatmul.mubr.f32.vlgmr.msra.gmra.mrb[0].mxu1 %v711_v54 }
 0x36c   : > { %837 = vmatprep.mubr.f32.mxu1 %v1610_v23 }
 0x36f   : > { %838 = vmatmul.mubr.f32.gmra.mrb[2].mxu1 %v712_v47 }
 0x370   : > { %843 = vmatprep.mubr.f32.mxu1 %v1610_v23 }
 0x373   : > { %844 = vmatmul.mubr.f32.gmra.mrb[4].mxu1 %v713_v58 }
 0x374   : > { %849 = vmatprep.mubr.f32.mxu1 %v1610_v23 }
 0x377   : > { %850 = vmatmul.mubr.f32.gmra.mrb[6].mxu1 %v714_v24 }
 0x378   : > { %855 = vmatprep.mubr.f32.mxu1 %v1610_v23 }
 0x37b   : > { %856 = vmatmul.mubr.f32.gmra.mrb[8].mxu1 %v715_v9 }
 0x37c   : > { %861 = vmatprep.mubr.f32.mxu1 %v1610_v23 }
 0x37f   : > { %862 = vmatmul.mubr.f32.gmra.mrb[10].mxu1 %v716_v11 }
 0x380   : > { %867 = vmatprep.mubr.f32.mxu1 %v1610_v23 }
 0x383   : > { %868 = vmatmul.mubr.f32.gmra.mrb[12].mxu1 %v717_v15 }
 0x384   : > { %873 = vmatprep.mubr.f32.mxu1 %v1610_v23 }
 0x387   : > { %874 = vmatmul.mubr.f32.gmra.mrb[14].mxu1 %v718_v3 }
 0x43e   : > { %v833_v4 = vpop.f32.mrb[0].mxu1 }
 0x43f   : > { %v835_v35 = vpop.f32.mrb[1].mxu1  ;;  %v834_v30 = vadd.f32 %v833_v4, %v730_v49  ;;  %v740_v4 = vpop.permute.xlu1 %739 }
 0x440   : > { %v836_v44 = vadd.f32 %v835_v35, %v730_v49 }
 0x442   : > { %v839_v46 = vpop.f32.mrb[2].mxu1 }
 0x443   : > { %v841_v50 = vpop.f32.mrb[3].mxu1  ;;  %v840_v22 = vadd.f32 %v839_v46, %v735_v59 }
 0x444   : > { %v842_v58 = vadd.f32 %v841_v50, %v735_v59 }
 0x446   : > { %v2233_v36 = vpop.f32.mrb[4].mxu1 }
 0x447   : > { %v2235_v38 = vpop.f32.mrb[5].mxu1  ;;  %v846_v50 = vadd.f32 %v2233_v36, %v740_v4 }
 0x44a   : > { %v2237_v41 = vpop.f32.mrb[6].mxu1 }
 0x44b   : > { %v2239_v43 = vpop.f32.mrb[7].mxu1 }
 0x44e   : > { %v857_v32 = vpop.f32.mrb[8].mxu1 }
 0x44f   : > { %v858_v23 = vadd.f32 %v857_v32, %v750_v27  ;;  %v859_v8 = vpop.f32.mrb[9].mxu1 }
 0x450   : > { %v860_v42 = vadd.f32 %v859_v8, %v750_v27  ;;  %v848_v8 = vadd.f32 %v2235_v38, %v740_v4  ;;  %v1488_v38 = vld [vmem:[%s1762_s11 + $0x20] sm:$0xff] }
 0x451   : > { %v888_v45 = vmul.f32 0.5, %v858_v23 }
 0x452   : > { %v889_v51 = vmul.f32 0.5, %v860_v42  ;;  %v863_v52 = vpop.f32.mrb[10].mxu1  ;;  %v1487_v42 = vld [vmem:[%s1762_s11 + $0x18] sm:$0xff] }
 0x453   : > { %1469 = vtanh.f32 %v888_v45  ;;  %v864_v53 = vadd.f32 %v863_v52, %v755_v48  ;;  %v865_v55 = vpop.f32.mrb[11].mxu1 }
 0x454   : > { %1471 = vtanh.f32 %v889_v51  ;;  %v866_v61 = vadd.f32 %v865_v55, %v755_v48  ;;  %v745_v55 = vpop.permute.xlu0 %744 }
 0x455   : > { %v890_v62 = vmul.f32 0.5, %v864_v53 }
 0x456   : > { %v891_v1 = vmul.f32 0.5, %v866_v61  ;;  %v869_v13 = vpop.f32.mrb[12].mxu1 }
 0x457   : > { %1473 = vtanh.f32 %v890_v62  ;;  %v870_v14 = vadd.f32 %v869_v13, %v760_v63  ;;  %v871_v16 = vpop.f32.mrb[13].mxu1  ;;  %v852_v62 = vadd.f32 %v2237_v41, %v745_v55  ;;  %v854_v13 = vadd.f32 %v2239_v43, %v745_v55  ;;  %v1490_v43 = vld [vmem:[%s1762_s11 + $0x38] sm:$0xff] }
 0x458   : > { %1475 = vtanh.f32 %v891_v1  ;;  %v872_v18 = vadd.f32 %v871_v16, %v760_v63 }
 0x459   : > { %v892_v19 = vmul.f32 0.5, %v870_v14  ;;  %v1489_v14 = vld [vmem:[%s1762_s11 + $0x28] sm:$0xff] }
 0x45a   : > { %v893_v28 = vmul.f32 0.5, %v872_v18  ;;  %v875_v29 = vpop.f32.mrb[14].mxu1  ;;  %v886_v18 = vld [vmem:[%s1762_s11 + $0x30] sm:$0xff] }
 0x45b   : > { %1477 = vtanh.f32 %v892_v19  ;;  %v876_v31 = vadd.f32 %v875_v29, %v765_v21  ;;  %v877_v7 = vpop.f32.mrb[15].mxu1 }
 0x45c   : > { %1479 = vtanh.f32 %v893_v28  ;;  %v878_v20 = vadd.f32 %v877_v7, %v765_v21 }
 0x45d   : > { %v1470_v34 = vpop.eup %1469  ;;  %v894_v2 = vmul.f32 0.5, %v876_v31 }
 0x45e   : > { %v1472_v6 = vpop.eup %1471  ;;  %v904_v5 = vadd.f32 1.0, %v1470_v34  ;;  %v895_v17 = vmul.f32 0.5, %v878_v20 }
 0x45f   : > { %v905_v37 = vadd.f32 1.0, %v1472_v6  ;;  %1481 = vtanh.f32 %v894_v2 }
 0x460   : > { %v912_v33 = vmul.f32 0.5, %v904_v5  ;;  %1483 = vtanh.f32 %v895_v17 }
 0x461   : > { %v1474_v40 = vpop.eup %1473  ;;  %v913_v56 = vmul.f32 0.5, %v905_v37 }
 0x462   : > { %v1476_v57 = vpop.eup %1475  ;;  %v920_v12 = vmul.f32 %v912_v33, %v834_v30  ;;  %v906_v39 = vadd.f32 1.0, %v1474_v40 }
 0x463   : > { %v921_v60 = vmul.f32 %v913_v56, %v836_v44  ;;  %v907_v0 = vadd.f32 1.0, %v1476_v57 }
 0x464   : > { %v928_v26 = vadd.f32 %v1485_v25, %v920_v12  ;;  %v914_v54 = vmul.f32 0.5, %v906_v39 }
 0x465   : > { %v1478_v47 = vpop.eup %1477  ;;  %v929_v24 = vadd.f32 %v921_v60, %v1775_v10  ;;  %v915_v9 = vmul.f32 0.5, %v907_v0  ;;  %v1486_v10 = vld [vmem:[%s1762_s11 + $0x10] sm:$0xff] }
 0x466   : > { %v1480_v11 = vpop.eup %1479  ;;  %936 = vst [vmem:[%s2245_s13] sm:$0xff] %v928_v26  ;;  %v922_v15 = vmul.f32 %v914_v54, %v840_v22  ;;  %v908_v3 = vadd.f32 1.0, %v1478_v47 }
 0x467   : > { %937 = vst [vmem:[%s2245_s13 + $0x8] sm:$0xff] %v929_v24  ;;  %v923_v35 = vmul.f32 %v915_v9, %v842_v58  ;;  %v909_v46 = vadd.f32 1.0, %v1480_v11 }
 0x468   : > { %v930_v27 = vadd.f32 %v1486_v10, %v922_v15  ;;  %v916_v32 = vmul.f32 0.5, %v908_v3 }
 0x469   : > { %v1482_v23 = vpop.eup %1481  ;;  %v931_v45 = vadd.f32 %v1487_v42, %v923_v35  ;;  %v917_v48 = vmul.f32 0.5, %v909_v46 }
 0x46a   : > { %v1484_v51 = vpop.eup %1483  ;;  %938 = vst [vmem:[%s2245_s13 + $0x10] sm:$0xff] %v930_v27  ;;  %v924_v52 = vmul.f32 %v916_v32, %v846_v50  ;;  %v910_v53 = vadd.f32 1.0, %v1482_v23 }
 0x46b   : > { %939 = vst [vmem:[%s2245_s13 + $0x18] sm:$0xff] %v931_v45  ;;  %v925_v36 = vmul.f32 %v917_v48, %v848_v8  ;;  %v911_v61 = vadd.f32 1.0, %v1484_v51 }
 0x46c   : > { %v932_v63 = vadd.f32 %v1488_v38, %v924_v52  ;;  %v918_v1 = vmul.f32 0.5, %v910_v53 }
 0x46d   : > { %v933_v16 = vadd.f32 %v1489_v14, %v925_v36  ;;  %v919_v19 = vmul.f32 0.5, %v911_v61 }
 0x46e   : > { %940 = vst [vmem:[%s2245_s13 + $0x20] sm:$0xff] %v932_v63  ;;  %v926_v21 = vmul.f32 %v918_v1, %v852_v62 }
 0x46f   : > { %941 = vst [vmem:[%s2245_s13 + $0x28] sm:$0xff] %v933_v16  ;;  %v927_v41 = vmul.f32 %v919_v19, %v854_v13 }
 0x470   : > { %v934_v28 = vadd.f32 %v926_v21, %v886_v18 }
 0x471   : > { %v935_v29 = vadd.f32 %v1490_v43, %v927_v41 }
 0x472   : > { %942 = vst [vmem:[%s2245_s13 + $0x30] sm:$0xff] %v934_v28 }
 0x473   : > { %943 = vst [vmem:[%s2245_s13 + $0x38] sm:$0xff] %v935_v29 }
 0x474   : > { %1534 = shalt.err (!%p1531_p5)
}
 0x475   : > { %s1535_s11 = scalar_lea.hbm %s2267_s10, 1024  ;;  %s1539_s13 = scalar_lea.hbm %s2327_s5, 2048 }
 0x476   : > { %p1536_p4 = scmp.ne.s32.totalorder %s2267_s10, %s1535_s11  ;;  %p1540_p12 = scmp.lt.u32.totalorder %s2267_s10, %s2327_s5 }
 0x477   : > { %p1541_p1 = scmp.lt.u32.totalorder %s1539_s13, %s1535_s11  ;;  %p1543_p8 = scmp.lt.u32.totalorder %s1535_s11, %s2267_s10 }
 0x478   : > { %p1537_p7 = pnand %p1536_p4, %p2341_p9 }
 0x479   : > { %p1542_p3 = por %p1541_p1, %p1540_p12 }
 0x47a   : > { %p1538_p10 = pneg %p1537_p7 }
 0x47b   : > { %p1544_p11 = por %p1543_p8, %p1542_p3 }
 0x47d   : > { %p1545_p0 = pnand %p1544_p11, %p1538_p10 }
 0x47f   : > { %1548 = shalt.err (!%p1545_p0)
}
 0x480   : > { %s1613_s27 = smov 256  }
 0x481   : > { %1248 = dma.vmem_to_hbm [thread:$0]  (%p2341_p9), %s2270_s15, 1024, %s2267_s10, %s945_s21, %s1613_s27, %s1613_s27, %s1608_s30  }
 0x482 PF: > { %s975_s16 = sand.u32 1, %s1583_s18   ;;  %p2342_p6 = scmp.ne.s32.totalorder %s2332_s8, 0 }
 0x483   : > { %p2343_p13 = scmp.ge.s32.totalorder %s1603_s23, 2  ;;  %s976_s17 = scalar_lea.sflag [#allocation6], %s975_s16 }
 0x485   : > { %p1255_p2 = pnand %p2343_p13, %p2342_p6 }
 0x487   : > { %1578 = dma.done.wait (!%p1255_p2), %s976_s17, 1024  }
 0x488   : > { %1580 = vsyncadd (!%p1255_p2), %s976_s17, 4294966272  ;;  %s21_s23 = sadd.s32 1, %s1603_s23   ;;  %s2344_s18 = smov %s1587_s19 }
 0x489   : > { %p18_p5 = scmp.ge.s32.totalorder %s21_s23, 4   ;;  %s2345_s19 = smov %s1591_s20 }
 0x48a   : > { %s2346_s20 = smov %s1700_s7  ;;  %s2347_s21 = smov %s1599_s22 }
 0x48b   : > { %s2348_s22 = smov %s2350_s26  ;;  %20 = sbr.rel (!%p18_p5) target bundleno = 6 (0x6), region = 89 }
 0x492   :  { %981 = vsyncpa [#allocation5], 1 }
 0x493   :  { %983 = vsyncpa [#allocation5 + $0x1], 1 }
 0x494   :  { %984 = vsyncpa [#allocation6], 1 }
 0x495   :  { %986 = vsyncpa [#allocation6 + $0x1], 1 }

</bundles_post_ra>
